<compile_context>
chip_gen: v7x
topology: tpu7x:2x2x1
jax: 0.10.0
libtpu: 0.0.40
codegen_flags: <defaults>
</compile_context>

<pallas_src>
from functools import partial
import math

import jax
import jax.numpy as jnp
from jax.experimental import pallas as pl
from jax.experimental.pallas import tpu as pltpu

_LANE = 128


def _round_up(a, b):
    return (a + b - 1) // b * b


def _drop_path_kernel(keep_ref, x_ref, o_ref, *, inv_keep_prob):
    # keep_ref: (B,) int32 in SMEM (scalar prefetch); x_ref/o_ref: (1, tr, 128).
    b = pl.program_id(0)
    # keep in {0,1}  ->  scale in {0, 1/keep_prob}; f32 math, cast on store.
    scale = keep_ref[b].astype(jnp.float32) * inv_keep_prob
    o_ref[...] = (x_ref[...] * scale).astype(o_ref.dtype)


def drop_path(x, drop_prob, training, key, *, block_rows=2048):
    """Per-sample stochastic depth. x: (B, ...) -> same shape/dtype."""
    if drop_prob is None or float(drop_prob) == 0.0 or not training:
        return x
    keep_prob = 1.0 - float(drop_prob)

    B = x.shape[0]
    orig_shape = x.shape
    L = math.prod(x.shape[1:])

    # Per-sample Bernoulli(keep_prob) keep decision (int32 -> SMEM prefetch).
    keep = (jax.random.uniform(key, (B,)) < keep_prob).astype(jnp.int32)

    itemsize = jnp.dtype(x.dtype).itemsize
    pack = max(8, 32 // itemsize)          # sublane packing: f32 8, bf16 16, i8 32

    R = pl.cdiv(L, _LANE)                  # rows of 128 lanes per sample

    # Cap the row tile so in+out double buffers stay well under v5e's 16 MiB
    # scoped-VMEM default (<= 2 MiB per block => <= 8 MiB of buffers).
    vmem_row_cap = max(pack, ((2 << 20) // (_LANE * itemsize)) // pack * pack)
    tr_cap = min(_round_up(block_rows, pack), vmem_row_cap)
    # Whole sample per block when it fits (tr == full dim satisfies the (8,128)
    # rule even when R is not a multiple of `pack`).
    tr = R if R <= tr_cap else tr_cap

    # v7x has 2 TensorCores: keep at least 2 parallel grid steps when B == 1.
    if B == 1 and pl.cdiv(R, tr) == 1 and R > pack:
        tr = _round_up(pl.cdiv(R, 2), pack)

    grid_j = pl.cdiv(R, tr)

    # Lay each sample out as rows of 128 lanes.  Fast path (no extra copies)
    # when L is lane-aligned; otherwise pad only the <128-element lane tail.
    xf = x.reshape(B, L)
    ragged_tail = (L % _LANE) != 0
    if ragged_tail:
        # TODO(synk): handle the small tail outside the kernel instead of a
        # full-tensor pad copy; the common transformer case never hits this.
        xf = jnp.pad(xf, ((0, 0), (0, R * _LANE - L)))
    x3 = xf.reshape(B, R, _LANE)

    out = pl.pallas_call(
        partial(_drop_path_kernel, inv_keep_prob=1.0 / keep_prob),
        out_shape=jax.ShapeDtypeStruct((B, R, _LANE), x.dtype),
        grid_spec=pltpu.PrefetchScalarGridSpec(
            num_scalar_prefetch=1,
            grid=(B, grid_j),
            in_specs=[
                # Dropped samples pin the input block index at row-block 0, so
                # Pallas skips the prefetch DMA for every later row block of
                # that sample (block index unchanged from the previous step).
                pl.BlockSpec((1, tr, _LANE),
                             lambda b, j, keep_ref: (b, j * keep_ref[b], 0)),
            ],
            out_specs=pl.BlockSpec((1, tr, _LANE),
                                   lambda b, j, keep_ref: (b, j, 0)),
        ),
        compiler_params=pltpu.CompilerParams(
            dimension_semantics=("parallel", "parallel")),
    )(keep, x3)

    out = out.reshape(B, R * _LANE)
    if ragged_tail:
        out = out[:, :L]
    return out.reshape(orig_shape)


class DropPath:
    """Mirror of the PyTorch module (stateless; pass training flag + PRNG key)."""

    def __init__(self, drop_prob=None):
        self.drop_prob = drop_prob

    def __call__(self, x, *, training, key):
        return drop_path(x, self.drop_prob, training, key)


if __name__ == "__main__":
    drop_prob = 0.25
    keep_prob = 1.0 - drop_prob

    root = jax.random.PRNGKey(0)
    kx, kmask, kx2 = jax.random.split(root, 3)

    module = DropPath(drop_prob)

    def ref_drop_path(x, key):
        # Same per-sample mask generation as the wrapper (keep mask generation
        # in one place: jax.random.uniform on the given key).
        keep = (jax.random.uniform(key, (x.shape[0],)) < keep_prob).astype(x.dtype)
        return x * (keep / keep_prob).reshape((-1,) + (1,) * (x.ndim - 1))

    # Case 1: typical transformer block input; L = 8*32 = 256 is lane-aligned,
    # whole sample fits in one block -> grid (B, 1), zero pad/slice copies.
    B, N, D = 2, 8, 32
    x = jax.random.normal(kx, (B, N, D), dtype=jnp.float32)
    out = jax.block_until_ready(module(x, training=True, key=kmask))
    assert out.shape == x.shape and out.dtype == x.dtype
    assert jnp.allclose(out, ref_drop_path(x, kmask), atol=1e-6, rtol=1e-6)

    # Case 2: multiple row blocks with a ragged last block (R=10, tr=8) to
    # exercise edge masking and the dropped-sample DMA skip.
    x2 = jax.random.normal(kx2, (2, 10, _LANE), dtype=jnp.float32)
    out2 = jax.block_until_ready(
        drop_path(x2, drop_prob, True, kmask, block_rows=8))
    assert jnp.allclose(out2, ref_drop_path(x2, kmask), atol=1e-6, rtol=1e-6)

    # Case 3: ragged lane tail (L = 7*48 = 336, not a multiple of 128).
    x3 = jax.random.normal(kx2, (2, 7, 48), dtype=jnp.float32)
    out3 = jax.block_until_ready(module(x3, training=True, key=kmask))
    assert jnp.allclose(out3, ref_drop_path(x3, kmask), atol=1e-6, rtol=1e-6)

    # Eval path is identity (no kernel launch).
    out_eval = jax.block_until_ready(module(x, training=False, key=kmask))
    assert jnp.allclose(out_eval, x)

    print("KERNEL_OK")
</pallas_src>

<mosaic_0001>
module attributes {stable_mosaic.version = 11 : i64} {
  func.func @_drop_path_kernel(%arg0: i32, %arg1: i32, %arg2: memref<2xi32, #tpu.memory_space<smem>>, %arg3: memref<1x2x128xf32, #tpu.memory_space<vmem>>, %arg4: memref<1x2x128xf32, #tpu.memory_space<vmem>>) attributes {dimension_semantics = [#tpu.dimension_semantics<parallel>, #tpu.dimension_semantics<parallel>], iteration_bounds = array<i64: 2, 1>, scalar_prefetch = 1 : i64, scratch_operands = 0 : i64, tpu.core_type = #tpu.core_type<tc>, window_params = [{transform_indices = @transform_0, window_bounds = array<i64: 1, 2, 128>}, {transform_indices = @transform_1, window_bounds = array<i64: 1, 2, 128>}]} {
    %0 = arith.index_cast %arg0 : i32 to index
    %1 = memref.load %arg2[%0] : memref<2xi32, #tpu.memory_space<smem>>
    %2 = arith.sitofp %1 : i32 to f32
    %cst = arith.constant 1.33333337 : f32
    %3 = arith.mulf %2, %cst : f32
    %c0 = arith.constant 0 : index
    %c0_0 = arith.constant 0 : index
    %c0_1 = arith.constant 0 : index
    %4 = vector.load %arg3[%c0, %c0_0, %c0_1] : memref<1x2x128xf32, #tpu.memory_space<vmem>>, vector<1x2x128xf32>
    %5 = vector.broadcast %3 : f32 to vector<1x2x128xf32>
    %6 = arith.mulf %4, %5 : vector<1x2x128xf32>
    %c0_2 = arith.constant 0 : index
    %c0_3 = arith.constant 0 : index
    %c0_4 = arith.constant 0 : index
    %7 = vector.load %arg4[%c0_2, %c0_3, %c0_4] : memref<1x2x128xf32, #tpu.memory_space<vmem>>, vector<1x2x128xf32>
    tpu.vector_store %arg4[%c0_2, %c0_3, %c0_4], %6 {strides = array<i32>} : memref<1x2x128xf32, #tpu.memory_space<vmem>>, vector<1x2x128xf32>,
    return
  }
  func.func @transform_0(%arg0: i32, %arg1: i32, %arg2: memref<2xi32, #tpu.memory_space<smem>>) -> (i32, i32, i32) {
    %0 = arith.index_cast %arg0 : i32 to index
    %1 = memref.load %arg2[%0] : memref<2xi32, #tpu.memory_space<smem>>
    %2 = arith.muli %arg1, %1 : i32
    %c0_i32 = arith.constant 0 : i32
    %c0_i32_0 = arith.constant 0 : i32
    return %arg0, %2, %c0_i32 : i32, i32, i32
  }
  func.func @transform_1(%arg0: i32, %arg1: i32, %arg2: memref<2xi32, #tpu.memory_space<smem>>) -> (i32, i32, i32) {
    %c0_i32 = arith.constant 0 : i32
    %c0_i32_0 = arith.constant 0 : i32
    return %arg0, %arg1, %c0_i32 : i32, i32, i32
  }
}

</mosaic_0001>

<bundles_post_ra>
// kernel: tpu_custom_call.1
= control target key start
LH: loop header
LB: loop body
LE: loop exit
PB: predicated region body
PF: predicated region fallthrough
CT: control target
= control target key end

     0   :  { %s669_s0 = inlined_call_operand.hbm [shape: s32[2], index: 0, kind: input, shape index: {}]   ;;  %s670_s1 = inlined_call_operand.hbm [shape: f32[2,2,128], index: 1, kind: input, shape index: {}]   ;;  %s671_s2 = inlined_call_operand.hbm [shape: f32[2,2,128], index: 2, kind: output, shape index: {}]  }
   0x1   :  { %s340_s11 = scalar_lea.hbm %s669_s0, 16 }
   0x2   :  { %p341_p0 = scmp.ne.s32.totalorder %s669_s0, %s340_s11  ;;  %p344_p1 = scmp.lt.u32.totalorder %s340_s11, %s669_s0 }
   0x4   :  { %p346_p2 = pnand %p344_p1, %p341_p0 }
   0x6   :  { %349 = shalt.err (!%p346_p2)  }
   0x7   :  { %s466_s16 = smov [#allocation3]  }
   0x8   :  { %8 = dma.hbm_to_smem %s669_s0, 16, %s466_s16, [#allocation2] }
   0x9   :  { %432 = dma.done.wait [#allocation2], 16 }
   0xa   :  { %433 = vsyncadd [#allocation2], 4294967280 }
   0xb   :  { %10 = sfence }
   0xc   :  { %11 = vsyncpa [#allocation5], 0 }
   0xd   :  { %13 = vsyncpa [#allocation5 + $0x1], 0 }
   0xe   :  { %14 = vsyncpa [#allocation6], 0 }
   0xf   :  { %16 = vsyncpa [#allocation6 + $0x1], 0  ;;  %s496_s19 = smov 0   ;;  %s498_s20 = smov 0  }
  0x10   :  { %s500_s21 = smov 0   ;;  %s502_s22 = smov 0  }
  0x11   :  { %s504_s23 = smov 0   ;;  %s506_s24 = smov 0  }
  0x12 LB: > { %s264_s0 = sadd.s32 4294967295, %s464_s24   ;;  %s265_s25 = sadd.s32 4294967294, %s464_s24   ;;  %s464_s24 = sphi %s506_s24, %s22_s24   ;;  %s460_s23 = sphi %s504_s23, %s687_s23   ;;  %s456_s22 = sphi %s502_s22, %s686_s22   ;;  %s452_s21 = sphi %s500_s21, %s685_s21   ;;  %s448_s20 = sphi %s498_s20, %s684_s20   ;;  %s444_s19 = sphi %s496_s19, %s683_s19  }
  0x13   : > { %s34_s26 = sadd.s32 1, %s460_s23  ;;  %s47_s27 = sadd.s32 1, %s452_s21 }
  0x14   : > { %p36_p3 = scmp.ge.s32.totalorder %s34_s26, 2  ;;  %p54_p4 = scmp.ne.s32.totalorder %s452_s21, %s448_s20 }
  0x15   : > { %p55_p5 = scmp.eq.s32.totalorder %s464_s24, 0  ;;  %p60_p6 = scmp.ne.s32.totalorder %s448_s20, %s444_s19 }
  0x16   : > { %s689_s26 = smov (%p36_p3, %s34_s26), 0  ;;  %p61_p8 = scmp.eq.s32.totalorder %s264_s0, 0 }
  0x17   : > { %p537_p7 = por %p55_p5, %p54_p4  ;;  %s42_s29 = ssub.s32 %s460_s23, %s689_s26 }
  0x18   : > { %p86_p9 = scmp.eq.s32.totalorder %s264_s0, 1  ;;  %p45_p10 = scmp.eq.s32.totalorder %s42_s29, 0 }
  0x19   : > { %p543_p11 = por %p61_p8, %p60_p6  ;;  %p92_p13 = scmp.eq.s32.totalorder %s265_s25, 1 }
  0x1a   : > { %p547_p12 = por %p86_p9, %p54_p4  ;;  %p289_p2 = scmp.lt.s32.totalorder %s464_s24, 2 }
  0x1b   : > { %s552_s4 = scalar_select %p45_p10, %s452_s21, %s47_s27  }
  0x1c   : > { %s675_s3 = scalar_select %p547_p12, 1, 0 }
  0x1d   : > { %p554_p0 = por %p92_p13, %p60_p6  ;;  %s112_s6 = sand.u32 1, %s452_s21  }
  0x1e   : > { %s268_s7 = sshll.u32 %s112_s6, 1  ;;  %s269_s8 = sshll.u32 %s460_s23, 5 }
  0x1f   : > { %s676_s5 = scalar_select %p554_p0, 1, 0 }
  0x20   : > { %s565_s11 = scalar_lea.hbm %s670_s1, %s269_s8  ;;  %s116_s12 = scalar_lea.vmem [#allocation4], %s268_s7 }
  0x21   : > { %s126_s13 = sshll.u32 %s116_s12, 4  ;;  %p571_p3 = pnand %p289_p2, %p537_p7  ;;  %s567_s13 = int_to_ptr.vmem [resolvable:$true] %s126_s13 }
  0x22   : > { %s113_s15 = scalar_lea.sflag [#allocation5], %s112_s6  ;;  %s350_s16 = scalar_lea.hbm %s565_s11, 32 }
  0x23   : > { %p351_p6 = scmp.ne.s32.totalorder %s565_s11, %s350_s16  ;;  %p352_p8 = pneg %p571_p3 }
  0x24   : > { %s355_s0 = scalar_lea.hbm %s670_s1, 64  ;;  %p356_p7 = scmp.lt.u32.totalorder %s565_s11, %s670_s1 }
  0x25   : > { %p353_p9 = pnand %p352_p8, %p351_p6  ;;  %p357_p13 = scmp.lt.u32.totalorder %s355_s0, %s350_s16 }
  0x26   : > { %p359_p1 = scmp.lt.u32.totalorder %s350_s16, %s565_s11 }
  0x27   : > { %p354_p10 = pneg %p353_p9  ;;  %p358_p2 = por %p357_p13, %p356_p7 }
  0x29   : > { %p360_p4 = por %p359_p1, %p358_p2 }
  0x2b   : > { %p361_p5 = pnand %p360_p4, %p354_p10 }
  0x2d   : > { %364 = shalt.err (!%p361_p5)
}
  0x2e   : > { %s365_s28 = scalar_lea.vmem %s567_s13, 32  ;;  %s467_s29 = smov [#allocation4]  }
  0x2f   : > { %p366_p6 = scmp.ne.s32.totalorder %s567_s13, %s365_s28  ;;  %s370_s6 = sshll.u32 %s467_s29, 4  ;;  %s371_s6 = int_to_ptr.vmem [resolvable:$false] %s370_s6 }
  0x30   : > { %s372_s7 = scalar_lea.vmem %s371_s6, 64  ;;  %p373_p12 = scmp.lt.s32.totalorder %s567_s13, %s371_s6 }
  0x31   : > { %p368_p9 = pnand %p366_p6, %p352_p8  ;;  %p374_p7 = scmp.lt.s32.totalorder %s372_s7, %s365_s28 }
  0x33   : > { %p369_p0 = pneg %p368_p9  ;;  %p375_p13 = por %p374_p7, %p373_p12 }
  0x35   : > { %p376_p1 = pnand %p375_p13, %p369_p0 }
  0x37   : > { %379 = shalt.err (!%p376_p1)
}
  0x38   : > { %284 = dma.hbm_to_vmem [thread:$0]  (!%p571_p3), %s565_s11, 32, %s567_s13, %s113_s15  }
  0x39   : > { %p678_p4 = scmp.lt.s32.totalorder %s464_s24, 3  ;;  %p679_p5 = scmp.ge.s32.totalorder %s464_s24, 1 }
  0x3b   : > { %p132_p8 = pnand %p679_p5, %p678_p4 }
  0x3c   : > { %s607_s8 = sand.u32 (!%p132_p8), 1, %s448_s20  }
  0x3d   : > { %135 = sbr.rel (%p132_p8) target bundleno = 97 (0x61), region = 24  ;;  %s271_s9 = sshll.u32 (!%p132_p8), %s607_s8, 1 }
  0x3e   : > { %s138_s10 = scalar_lea.sflag (!%p132_p8), [#allocation5], %s607_s8  ;;  %s141_s12 = scalar_lea.vmem (!%p132_p8), [#allocation4], %s271_s9 }
  0x44   : > { %435 = dma.done.wait (%p543_p11), %s138_s10, 32  }
  0x45   : > { %437 = vsyncadd (%p543_p11), %s138_s10, 4294967264  ;;  %s162_s11 = sld [smem:[#allocation3 + %s456_s22]]  ;;  %s159_s14 = scalar_lea.vmem [#allocation7], %s271_s9  ;;  %v165_v0 = vld [vmem:[%s141_s12] sm:$0x3] }
  0x46   : > { %s184_s15 = sshll.u32 %s159_s14, 4  ;;  %s274_s17 = sshll.u32 %s456_s22, 5  ;;  %s617_s15 = int_to_ptr.vmem [resolvable:$true] %s184_s15 }
  0x47   : > { %s622_s30 = scalar_lea.hbm %s671_s2, %s274_s17  ;;  %s170_s25 = scalar_lea.sflag [#allocation6], %s607_s8 }
  0x48   : > { %s380_s27 = scalar_lea.vmem %s617_s15, 32  ;;  %p680_p12 = scmp.ne.s32.totalorder %s675_s3, 0 }
  0x49   : > { %p381_p11 = scmp.ne.s32.totalorder %s617_s15, %s380_s27  ;;  %s468_s22 = smov [#allocation7]  }
  0x4a   : > { %s384_s28 = sshll.u32 %s468_s22, 4  ;;  %s385_s28 = int_to_ptr.vmem [resolvable:$false] %s384_s28 }
  0x4b   : > { %s163_s13 = scvt.s32.f32 %s162_s11  ;;  %p382_p0 = pnand %p381_p11, %p680_p12 }
  0x4c   : > { %s386_s29 = scalar_lea.vmem %s385_s28, 64  ;;  %p387_p10 = scmp.lt.s32.totalorder %s617_s15, %s385_s28 }
  0x4d   : > { %s164_s16 = smul.f32 1.3333334, %s163_s13  ;;  %p383_p3 = pneg %p382_p0 }
  0x4e   : > { %p388_p2 = scmp.lt.s32.totalorder %s386_s29, %s380_s27 }
  0x4f   : > { %v166_v1 = vstv %s164_s16 }
  0x50   : > { %v167_v2 = vmul.f32 %v166_v1, %v165_v0  ;;  %p389_p6 = por %p388_p2, %p387_p10 }
  0x52   : > { %168 = vst [vmem:[%s159_s14] sm:$0x3] %v167_v2  ;;  %p390_p9 = pnand %p389_p6, %p383_p3 }
  0x54   : > { %393 = shalt.err (!%p390_p9)
}
  0x55   : > { %s394_s6 = scalar_lea.hbm %s622_s30, 32  ;;  %s398_s9 = scalar_lea.hbm %s671_s2, 64 }
  0x56   : > { %p395_p7 = scmp.ne.s32.totalorder %s622_s30, %s394_s6  ;;  %p399_p4 = scmp.lt.u32.totalorder %s622_s30, %s671_s2 }
  0x57   : > { %p400_p5 = scmp.lt.u32.totalorder %s398_s9, %s394_s6  ;;  %p402_p11 = scmp.lt.u32.totalorder %s394_s6, %s622_s30 }
  0x58   : > { %p396_p13 = pnand %p395_p7, %p680_p12 }
  0x59   : > { %p401_p8 = por %p400_p5, %p399_p4 }
  0x5a   : > { %p397_p1 = pneg %p396_p13 }
  0x5b   : > { %p403_p0 = por %p402_p11, %p401_p8 }
  0x5d   : > { %p404_p3 = pnand %p403_p0, %p397_p1 }
  0x5f   : > { %407 = shalt.err (!%p404_p3)
}
  0x60   : > { %279 = dma.vmem_to_hbm [thread:$0]  (%p680_p12), %s617_s15, 32, %s622_s30, %s170_s25  }
  0x61 PF: > { %s196_s11 = sand.u32 1, %s444_s19   ;;  %p681_p10 = scmp.ne.s32.totalorder %s676_s5, 0 }
  0x62   : > { %p682_p2 = scmp.ge.s32.totalorder %s464_s24, 2  ;;  %s197_s13 = scalar_lea.sflag [#allocation6], %s196_s11 }
  0x64   : > { %p286_p6 = pnand %p682_p2, %p681_p10 }
  0x66   : > { %439 = dma.done.wait (!%p286_p6), %s197_s13, 32  }
  0x67   : > { %441 = vsyncadd (!%p286_p6), %s197_s13, 4294967264  ;;  %s22_s24 = sadd.s32 1, %s464_s24   ;;  %s683_s19 = smov %s448_s20 }
  0x68   : > { %p19_p9 = scmp.ge.s32.totalorder %s22_s24, 4   ;;  %s684_s20 = smov %s452_s21 }
  0x69   : > { %s685_s21 = smov %s552_s4  ;;  %s686_s22 = smov %s460_s23 }
  0x6a   : > { %s687_s23 = smov %s689_s26  ;;  %21 = sbr.rel (!%p19_p9) target bundleno = 18 (0x12), region = 69 }
  0x71   :  { %202 = vsyncpa [#allocation5], 1 }
  0x72   :  { %204 = vsyncpa [#allocation5 + $0x1], 1 }
  0x73   :  { %205 = vsyncpa [#allocation6], 1 }
  0x74   :  { %207 = vsyncpa [#allocation6 + $0x1], 1 }

</bundles_post_ra>
